<compile_context>
chip_gen: v6e
topology: v6e:2x2x1
jax: 0.10.0
libtpu: 0.0.40
codegen_flags: <defaults>
</compile_context>

<pallas_src>
import functools

import jax
import jax.numpy as jnp
from jax.experimental import pallas as pl
from jax.experimental.pallas import tpu as pltpu


def _channel_attention_kernel(x_ref, w1t_ref, w2t_ref, out_ref,
                              max_acc, sum_acc, *, hw_total, hw_tile):
    # x_ref:   (1, C, HW_TILE)  native dtype (bf16/f32) streaming block
    # w1t_ref: (C, Cr) f32      conv1 1x1 weight, transposed to (in, out)
    # w2t_ref: (Cr, C) f32      conv2 1x1 weight, transposed to (in, out)
    # out_ref: (1, 1, C)        attention row for this batch element
    # max_acc/sum_acc: (1, C) f32 running pooling accumulators (VMEM scratch)
    hw_idx = pl.program_id(1)

    @pl.when(hw_idx == 0)
    def _init():
        max_acc[...] = jnp.full_like(max_acc, -jnp.inf)
        sum_acc[...] = jnp.zeros_like(sum_acc)

    x = x_ref[...].astype(jnp.float32)                      # upcast after DMA

    if hw_total % hw_tile != 0:
        # Last HW tile is padded with garbage; mask out-of-range lanes.
        pos = hw_idx * hw_tile + jax.lax.broadcasted_iota(jnp.int32, x.shape, 2)
        valid = pos < hw_total
        x_max = jnp.where(valid, x, -jnp.inf)
        x_sum = jnp.where(valid, x, 0.0)
    else:
        x_max = x
        x_sum = x

    max_acc[...] = jnp.maximum(max_acc[...], jnp.max(x_max, axis=-1))
    sum_acc[...] = sum_acc[...] + jnp.sum(x_sum, axis=-1)

    @pl.when(hw_idx == pl.num_programs(1) - 1)
    def _finalize():
        max_p = max_acc[...]                                  # (1, C)
        avg_p = sum_acc[...] * jnp.float32(1.0 / hw_total)    # (1, C)
        w1t = w1t_ref[...]                                    # (C, Cr)
        w2t = w2t_ref[...]                                    # (Cr, C)
        # Fused SE branches: relu(max@W1) + relu(avg@W1), then one GEMM with W2.
        h = (jnp.maximum(jnp.dot(max_p, w1t, preferred_element_type=jnp.float32), 0.0)
             + jnp.maximum(jnp.dot(avg_p, w1t, preferred_element_type=jnp.float32), 0.0))
        logits = jnp.dot(h, w2t, preferred_element_type=jnp.float32)   # (1, C)
        attn = jax.nn.sigmoid(logits)
        out_ref[...] = attn[:, None, :].astype(out_ref.dtype)


def _pick_hw_tile(hw, c, itemsize, target_bytes=4 << 20):
    """Largest multiple-of-128 HW tile keeping one (1, C, tile) block under
    target_bytes; falls back to the full extent when that is smaller."""
    budget_tiles = max(1, target_bytes // (max(c, 1) * 128 * itemsize))
    full_tiles = pl.cdiv(hw, 128)
    tile = 128 * int(min(full_tiles, budget_tiles))
    if tile >= hw:
        return hw          # single full-extent block (block dim == array dim)
    return tile


def channel_attention(x, w1, w2, *, hw_tile=None):
    """CBAM channel attention.

    x:  (B, C, H, W) NCHW, any float dtype (kept native for the HBM stream)
    w1: (Cr, C) weight of Conv2d(C, Cr, 1, bias=False), Cr = C // reduction
    w2: (C, Cr) weight of Conv2d(Cr, C, 1, bias=False)
    Returns (B, C, 1, 1) sigmoid attention map (same dtype as x).
    """
    B, C, H, W = x.shape
    Cr = w1.shape[0]
    HW = H * W

    x_flat = x.reshape(B, C, HW)                     # no dtype cast: stream native bytes
    w1t = jnp.transpose(w1).astype(jnp.float32)      # (C, Cr)
    w2t = jnp.transpose(w2).astype(jnp.float32)      # (Cr, C)

    itemsize = jnp.dtype(x.dtype).itemsize
    if hw_tile is None:
        hw_tile = _pick_hw_tile(HW, C, itemsize)
    n_hw = pl.cdiv(HW, hw_tile)

    kernel = functools.partial(_channel_attention_kernel,
                               hw_total=HW, hw_tile=hw_tile)

    cost = pl.CostEstimate(
        flops=2 * B * C * HW + 2 * B * (2 * C * Cr + Cr * C),
        transcendentals=B * C,
        bytes_accessed=(x_flat.size * itemsize + w1t.nbytes + w2t.nbytes
                        + B * C * itemsize),
    )

    out = pl.pallas_call(
        kernel,
        out_shape=jax.ShapeDtypeStruct((B, 1, C), x.dtype),
        grid_spec=pltpu.PrefetchScalarGridSpec(
            num_scalar_prefetch=0,
            grid=(B, n_hw),                                   # HW (reduction) last
            in_specs=[
                pl.BlockSpec((1, C, hw_tile), lambda b, hw: (b, 0, hw)),
                pl.BlockSpec((C, Cr), lambda b, hw: (0, 0)),  # resident weights
                pl.BlockSpec((Cr, C), lambda b, hw: (0, 0)),
            ],
            out_specs=pl.BlockSpec((1, 1, C), lambda b, hw: (b, 0, 0)),
            scratch_shapes=[
                pltpu.VMEM((1, C), jnp.float32),              # running max
                pltpu.VMEM((1, C), jnp.float32),              # running sum
            ],
        ),
        compiler_params=pltpu.CompilerParams(
            dimension_semantics=("parallel", "arbitrary"),
            vmem_limit_bytes=32 * 1024 * 1024,                # safe on v5e/v6e/v7x
        ),
        cost_estimate=cost,
    )(x_flat, w1t, w2t)

    return out.reshape(B, C, 1, 1)


def reference_channel_attention(x, w1, w2):
    # Pure-JAX reference mirroring the PyTorch module.
    xf = x.astype(jnp.float32)
    max_p = jnp.max(xf, axis=(2, 3))                 # (B, C)
    avg_p = jnp.mean(xf, axis=(2, 3))                # (B, C)
    w1f = w1.astype(jnp.float32)
    w2f = w2.astype(jnp.float32)

    def se(p):
        return jnp.maximum(p @ w1f.T, 0.0) @ w2f.T

    out = jax.nn.sigmoid(se(max_p) + se(avg_p))[:, :, None, None]
    return out.astype(x.dtype)


if __name__ == "__main__":
    key = jax.random.PRNGKey(0)
    k_x, k_w1, k_w2, k_x2 = jax.random.split(key, 4)

    B, C, H, W = 2, 32, 16, 16
    reduction = 16
    Cr = max(C // reduction, 1)                      # 2

    x = jax.random.normal(k_x, (B, C, H, W), dtype=jnp.float32)
    # Conv2d(C, Cr, 1, bias=False).weight -> (Cr, C, 1, 1) -> (Cr, C)
    w1 = 0.1 * jax.random.normal(k_w1, (Cr, C), dtype=jnp.float32)
    # Conv2d(Cr, C, 1, bias=False).weight -> (C, Cr, 1, 1) -> (C, Cr)
    w2 = 0.1 * jax.random.normal(k_w2, (C, Cr), dtype=jnp.float32)

    # Force a multi-step HW reduction (grid = (B, 2)) to exercise the
    # accumulator init/finalize path.
    out = channel_attention(x, w1, w2, hw_tile=128)
    out = jax.block_until_ready(out)
    ref = reference_channel_attention(x, w1, w2)
    assert out.shape == (B, C, 1, 1)
    assert jnp.allclose(out, ref, atol=1e-5, rtol=1e-5)

    # Auto tile selection (single full-extent block for this small HW).
    out_auto = jax.block_until_ready(channel_attention(x, w1, w2))
    assert jnp.allclose(out_auto, ref, atol=1e-5, rtol=1e-5)

    # Non-multiple-of-128 spatial extent exercises the masked partial last tile.
    H2, W2 = 18, 18                                  # HW = 324
    x2 = jax.random.normal(k_x2, (B, C, H2, W2), dtype=jnp.float32)
    out2 = jax.block_until_ready(channel_attention(x2, w1, w2, hw_tile=128))
    ref2 = reference_channel_attention(x2, w1, w2)
    assert out2.shape == (B, C, 1, 1)
    assert jnp.allclose(out2, ref2, atol=1e-5, rtol=1e-5)

    print("KERNEL_OK")
</pallas_src>

<mosaic_0001>
module attributes {stable_mosaic.version = 11 : i64} {
  func.func @_channel_attention_kernel(%arg0: i32, %arg1: i32, %arg2: memref<1x32x128xf32, #tpu.memory_space<vmem>>, %arg3: memref<32x2xf32, #tpu.memory_space<vmem>>, %arg4: memref<2x32xf32, #tpu.memory_space<vmem>>, %arg5: memref<1x1x32xf32, #tpu.memory_space<vmem>>, %arg6: memref<1x32xf32, #tpu.memory_space<vmem>>, %arg7: memref<1x32xf32, #tpu.memory_space<vmem>>) attributes {dimension_semantics = [#tpu.dimension_semantics<parallel>, #tpu.dimension_semantics<arbitrary>], iteration_bounds = array<i64: 2, 2>, scalar_prefetch = 0 : i64, scratch_operands = 2 : i64, tpu.core_type = #tpu.core_type<tc>, window_params = [{transform_indices = @transform_0, window_bounds = array<i64: 1, 32, 128>}, {pipeline_mode = #tpu.pipeline_mode<synchronous>, transform_indices = @transform_1, window_bounds = array<i64: 32, 2>}, {pipeline_mode = #tpu.pipeline_mode<synchronous>, transform_indices = @transform_2, window_bounds = array<i64: 2, 32>}, {transform_indices = @transform_3, window_bounds = array<i64: 1, 1, 32>}]} {
    %c0_i32 = arith.constant 0 : i32
    %0 = arith.cmpi eq, %arg1, %c0_i32 : i32
    %1 = arith.extui %0 : i1 to i32
    %c0_i32_0 = arith.constant 0 : i32
    %2 = arith.cmpi ne, %1, %c0_i32_0 : i32
    scf.if %2 {
      %cst_13 = arith.constant 0xFF800000 : f32
      %15 = vector.broadcast %cst_13 : f32 to vector<1x32xf32>
      %c0_14 = arith.constant 0 : index
      %c0_15 = arith.constant 0 : index
      %16 = vector.load %arg6[%c0_14, %c0_15] : memref<1x32xf32, #tpu.memory_space<vmem>>, vector<1x32xf32>
      tpu.vector_store %arg6[%c0_14, %c0_15], %15 {strides = array<i32>} : memref<1x32xf32, #tpu.memory_space<vmem>>, vector<1x32xf32>,
      %cst_16 = arith.constant 0.000000e+00 : f32
      %17 = vector.broadcast %cst_16 : f32 to vector<1x32xf32>
      %c0_17 = arith.constant 0 : index
      %c0_18 = arith.constant 0 : index
      %18 = vector.load %arg7[%c0_17, %c0_18] : memref<1x32xf32, #tpu.memory_space<vmem>>, vector<1x32xf32>
      tpu.vector_store %arg7[%c0_17, %c0_18], %17 {strides = array<i32>} : memref<1x32xf32, #tpu.memory_space<vmem>>, vector<1x32xf32>,
    } else {
    }
    %c0 = arith.constant 0 : index
    %c0_1 = arith.constant 0 : index
    %c0_2 = arith.constant 0 : index
    %3 = vector.load %arg2[%c0, %c0_1, %c0_2] : memref<1x32x128xf32, #tpu.memory_space<vmem>>, vector<1x32x128xf32>
    %c0_3 = arith.constant 0 : index
    %c0_4 = arith.constant 0 : index
    %4 = vector.load %arg6[%c0_3, %c0_4] : memref<1x32xf32, #tpu.memory_space<vmem>>, vector<1x32xf32>
    %cst = arith.constant dense<0xFF800000> : vector<1x32xf32>
    %5 = vector.multi_reduction <maximumf>, %3, %cst [2] : vector<1x32x128xf32> to vector<1x32xf32>
    %6 = arith.maximumf %4, %5 : vector<1x32xf32>
    %c0_5 = arith.constant 0 : index
    %c0_6 = arith.constant 0 : index
    %7 = vector.load %arg6[%c0_5, %c0_6] : memref<1x32xf32, #tpu.memory_space<vmem>>, vector<1x32xf32>
    tpu.vector_store %arg6[%c0_5, %c0_6], %6 {strides = array<i32>} : memref<1x32xf32, #tpu.memory_space<vmem>>, vector<1x32xf32>,
    %c0_7 = arith.constant 0 : index
    %c0_8 = arith.constant 0 : index
    %8 = vector.load %arg7[%c0_7, %c0_8] : memref<1x32xf32, #tpu.memory_space<vmem>>, vector<1x32xf32>
    %cst_9 = arith.constant dense<0.000000e+00> : vector<1x32xf32>
    %9 = vector.multi_reduction <add>, %3, %cst_9 [2] : vector<1x32x128xf32> to vector<1x32xf32>
    %10 = arith.addf %8, %9 : vector<1x32xf32>
    %c0_10 = arith.constant 0 : index
    %c0_11 = arith.constant 0 : index
    %11 = vector.load %arg7[%c0_10, %c0_11] : memref<1x32xf32, #tpu.memory_space<vmem>>, vector<1x32xf32>
    tpu.vector_store %arg7[%c0_10, %c0_11], %10 {strides = array<i32>} : memref<1x32xf32, #tpu.memory_space<vmem>>, vector<1x32xf32>,
    %c1_i32 = arith.constant 1 : i32
    %12 = arith.cmpi eq, %arg1, %c1_i32 : i32
    %13 = arith.extui %12 : i1 to i32
    %c0_i32_12 = arith.constant 0 : i32
    %14 = arith.cmpi ne, %13, %c0_i32_12 : i32
    scf.if %14 {
      %c0_13 = arith.constant 0 : index
      %c0_14 = arith.constant 0 : index
      %15 = vector.load %arg6[%c0_13, %c0_14] : memref<1x32xf32, #tpu.memory_space<vmem>>, vector<1x32xf32>
      %c0_15 = arith.constant 0 : index
      %c0_16 = arith.constant 0 : index
      %16 = vector.load %arg7[%c0_15, %c0_16] : memref<1x32xf32, #tpu.memory_space<vmem>>, vector<1x32xf32>
      %cst_17 = arith.constant 3.906250e-03 : f32
      %17 = vector.broadcast %cst_17 : f32 to vector<1x32xf32>
      %18 = arith.mulf %16, %17 : vector<1x32xf32>
      %c0_18 = arith.constant 0 : index
      %c0_19 = arith.constant 0 : index
      %19 = vector.load %arg3[%c0_18, %c0_19] : memref<32x2xf32, #tpu.memory_space<vmem>>, vector<32x2xf32>
      %c0_20 = arith.constant 0 : index
      %c0_21 = arith.constant 0 : index
      %20 = vector.load %arg4[%c0_20, %c0_21] : memref<2x32xf32, #tpu.memory_space<vmem>>, vector<2x32xf32>
      %cst_22 = arith.constant dense<0.000000e+00> : vector<1x2xf32>
      %21 = tpu.matmul %15, %19, %cst_22 {dimension_numbers = #tpu.dot_dimension_numbers<[1], [0], [0], [1], [0, 0, 1, 1], [], []>} : vector<1x32xf32>, vector<32x2xf32>, vector<1x2xf32> -> vector<1x2xf32>
      %cst_23 = arith.constant 0.000000e+00 : f32
      %22 = vector.broadcast %cst_23 : f32 to vector<1x2xf32>
      %23 = arith.maximumf %21, %22 : vector<1x2xf32>
      %cst_24 = arith.constant dense<0.000000e+00> : vector<1x2xf32>
      %24 = tpu.matmul %18, %19, %cst_24 {dimension_numbers = #tpu.dot_dimension_numbers<[1], [0], [0], [1], [0, 0, 1, 1], [], []>} : vector<1x32xf32>, vector<32x2xf32>, vector<1x2xf32> -> vector<1x2xf32>
      %cst_25 = arith.constant 0.000000e+00 : f32
      %25 = vector.broadcast %cst_25 : f32 to vector<1x2xf32>
      %26 = arith.maximumf %24, %25 : vector<1x2xf32>
      %27 = arith.addf %23, %26 : vector<1x2xf32>
      %cst_26 = arith.constant dense<0.000000e+00> : vector<1x32xf32>
      %28 = tpu.matmul %27, %20, %cst_26 {dimension_numbers = #tpu.dot_dimension_numbers<[1], [0], [0], [1], [0, 0, 1, 1], [], []>} : vector<1x2xf32>, vector<2x32xf32>, vector<1x32xf32> -> vector<1x32xf32>
      %29 = arith.negf %28 : vector<1x32xf32>
      %30 = math.exp %29 : vector<1x32xf32>
      %cst_27 = arith.constant 1.000000e+00 : f32
      %31 = vector.broadcast %cst_27 : f32 to vector<1x32xf32>
      %32 = arith.addf %31, %30 : vector<1x32xf32>
      %33 = arith.divf %31, %32 : vector<1x32xf32>
      %34 = vector.shape_cast %33 : vector<1x32xf32> to vector<1x1x32xf32>
      %c0_28 = arith.constant 0 : index
      %c0_29 = arith.constant 0 : index
      %c0_30 = arith.constant 0 : index
      %35 = vector.load %arg5[%c0_28, %c0_29, %c0_30] : memref<1x1x32xf32, #tpu.memory_space<vmem>>, vector<1x1x32xf32>
      tpu.vector_store %arg5[%c0_28, %c0_29, %c0_30], %34 {strides = array<i32>} : memref<1x1x32xf32, #tpu.memory_space<vmem>>, vector<1x1x32xf32>,
    } else {
    }
    return
  }
  func.func @transform_0(%arg0: i32, %arg1: i32) -> (i32, i32, i32) {
    %c0_i32 = arith.constant 0 : i32
    %c0_i32_0 = arith.constant 0 : i32
    return %arg0, %c0_i32, %arg1 : i32, i32, i32
  }
  func.func @transform_1(%arg0: i32, %arg1: i32) -> (i32, i32) {
    %c0_i32 = arith.constant 0 : i32
    %c0_i32_0 = arith.constant 0 : i32
    %c0_i32_1 = arith.constant 0 : i32
    return %c0_i32, %c0_i32_0 : i32, i32
  }
  func.func @transform_2(%arg0: i32, %arg1: i32) -> (i32, i32) {
    %c0_i32 = arith.constant 0 : i32
    %c0_i32_0 = arith.constant 0 : i32
    %c0_i32_1 = arith.constant 0 : i32
    return %c0_i32, %c0_i32_0 : i32, i32
  }
  func.func @transform_3(%arg0: i32, %arg1: i32) -> (i32, i32, i32) {
    %c0_i32 = arith.constant 0 : i32
    %c0_i32_0 = arith.constant 0 : i32
    %c0_i32_1 = arith.constant 0 : i32
    return %arg0, %c0_i32, %c0_i32_0 : i32, i32, i32
  }
}

</mosaic_0001>

<bundles_post_ra>
// kernel: tpu_custom_call.1
= control target key start
LH: loop header
LB: loop body
LE: loop exit
PB: predicated region body
PF: predicated region fallthrough
CT: control target
= control target key end

     0   :  { %8 = vsyncpa [#allocation5], 0  ;;  %s2049_s0 = inlined_call_operand.hbm [shape: f32[2,32,256], index: 0, kind: input, shape index: {}]   ;;  %s2050_s1 = inlined_call_operand.vmem [shape: f32[32,2], index: 1, kind: input, shape index: {}]   ;;  %s2051_s2 = inlined_call_operand.vmem [shape: f32[2,32], index: 2, kind: input, shape index: {}]   ;;  %s2052_s3 = inlined_call_operand.hbm [shape: f32[2,1,32], index: 3, kind: output, shape index: {}]  }
   0x1   :  { %10 = vsyncpa [#allocation5 + $0x1], 0 }
   0x2   :  { %11 = vsyncpa [#allocation6], 0 }
   0x3   :  { %13 = vsyncpa [#allocation6 + $0x1], 0  ;;  %s1688_s12 = smov 0   ;;  %s1690_s13 = smov 0  }
   0x4   :  { %s1692_s14 = smov 0   ;;  %s1694_s15 = smov 0  }
   0x5   :  { %s1696_s16 = smov 0   ;;  %s1698_s17 = smov 0  }
   0x6   :  { %s1700_s18 = smov 0   ;;  %s1702_s19 = smov 0  }
   0x7   :  { %s1704_s20 = smov 0   ;;  %s1706_s21 = smov 0  }
   0x8   :  { %s1708_s22 = smov 0  }
   0x9 LB: > { %2056 = sst [smem:[#allocation10_spill]] %s1635_s17  ;;  %s1332_s23 = sadd.s32 4294967295, %s1655_s22   ;;  %s1655_s22 = sphi %s1708_s22, %s19_s22   ;;  %s1651_s21 = sphi %s1706_s21, %s2077_s21   ;;  %s1647_s20 = sphi %s1704_s20, %s2076_s20   ;;  %s1643_s19 = sphi %s1702_s19, %s2075_s19   ;;  %s1639_s18 = sphi %s1700_s18, %s2074_s18   ;;  %s1635_s17 = sphi %s1698_s17, %s2066_s17   ;;  %s1631_s16 = sphi %s1696_s16, %s2073_s16   ;;  %s1627_s15 = sphi %s1694_s15, %s2072_s15   ;;  %s1623_s14 = sphi %s1692_s14, %s2071_s14   ;;  %s1619_s13 = sphi %s1690_s13, %s2070_s13   ;;  %s1615_s12 = sphi %s1688_s12, %s2069_s12  }
   0xa   : > { %s1333_s24 = sadd.s32 4294967294, %s1655_s22   ;;  %s28_s25 = sadd.s32 1, %s1647_s20 }
   0xb   : > { %s31_s26 = sadd.s32 1, %s1651_s21  ;;  %p29_p0 = scmp.ge.s32.totalorder %s28_s25, 2 }
   0xc   : > { %s40_s27 = sadd.s32 1, %s1635_s17  ;;  %p47_p1 = scmp.ne.s32.totalorder %s1635_s17, %s1631_s16 }
   0xd   : > { %p48_p2 = scmp.eq.s32.totalorder %s1655_s22, 0  ;;  %s2079_s25 = smov (%p29_p0, %s28_s25), 0 }
   0xe   : > { %2057 = sst [smem:[#allocation11_spill]] %s2079_s25  ;;  %s2081_s26 = smov (!%p29_p0, %s31_s26), %s1651_s21 }
   0xf   : > { %s36_s28 = ssub.s32 %s1647_s20, %s2079_s25  ;;  %p1754_p3 = por %p48_p2, %p47_p1 }
  0x10   : > { %p33_p4 = scmp.ge.s32.totalorder %s2081_s26, 2  ;;  %p53_p5 = scmp.ne.s32.totalorder %s1631_s16, %s1627_s15 }
  0x11   : > { %p54_p6 = scmp.eq.s32.totalorder %s1332_s23, 0  ;;  %s108_s30 = sadd.s32 1, %s1623_s14 }
  0x12   : > { %s2083_s26 = smov (%p33_p4, %s2081_s26), 0  ;;  %p118_p8 = scmp.ne.s32.totalorder %s1623_s14, %s1619_s13 }
  0x13   : > { %2059 = sst [smem:[#allocation12_spill]] %s2083_s26  ;;  %p1762_p7 = por %p54_p6, %p53_p5 }
  0x14   : > { %s35_s5 = ssub.s32 %s1651_s21, %s2083_s26  ;;  %p119_p9 = scmp.eq.s32.totalorder %s1332_s23, 3 }
  0x15   : > { %s37_s6 = sor.u32 %s36_s28, %s35_s5  ;;  %p106_p10 = scmp.eq.s32.totalorder %s35_s5, 0 }
  0x16   : > { %p38_p11 = scmp.eq.s32.totalorder %s37_s6, 0  ;;  %p1770_p12 = por %p119_p9, %p118_p8 }
  0x17   : > { %s1775_s8 = scalar_select %p106_p10, %s1623_s14, %s108_s30  }
  0x18   : > { %s1778_s9 = scalar_select %p38_p11, %s1635_s17, %s40_s27  }
  0x19   : > { %p124_p13 = scmp.ne.s32.totalorder %s1619_s13, %s1615_s12  ;;  %p125_p0 = scmp.eq.s32.totalorder %s1333_s24, 3 }
  0x1a   : > { %2062 = sst [smem:[#allocation13_spill]] %s1778_s9  ;;  %p1402_p1 = scmp.lt.s32.totalorder %s1655_s22, 4 }
  0x1b   : > { %p1783_p2 = por %p125_p0, %p124_p13  ;;  %s151_s11 = sand.u32 1, %s1635_s17  }
  0x1c   : > { %s1336_s15 = sshll.u32 %s151_s11, 5  ;;  %s1337_s23 = sshll.u32 %s1651_s21, 3 }
  0x1d   : > { %s160_s28 = sadd.s32 %s1647_s20, %s1337_s23  ;;  %s155_s5 = scalar_lea.vmem [#allocation4], %s1336_s15 }
  0x1e   : > { %s163_s6 = sshll.u32 %s155_s5, 4  ;;  %s1338_s26 = sshll.u32 %s160_s28, 7  ;;  %s164_s6 = int_to_ptr.vmem [resolvable:$true] %s163_s6 }
  0x1f   : > { %s162_s27 = scalar_lea.hbm %s2049_s0, %s1338_s26  ;;  %p1795_p4 = pnand %p1402_p1, %p1754_p3 }
  0x20   : > { %s152_s9 = scalar_lea.sflag [#allocation5], %s151_s11  ;;  %s1520_s17 = scalar_lea.vmem %s164_s6, 512 }
  0x21   : > { %p1509_p5 = pneg %p1795_p4  ;;  %p1521_p6 = scmp.ne.s32.totalorder %s164_s6, %s1520_s17 }
  0x22   : > { %s1657_s15 = smov [#allocation4]  }
  0x23   : > { %p1523_p8 = pnand %p1521_p6, %p1509_p5  ;;  %s1525_s23 = sshll.u32 %s1657_s15, 4  ;;  %s1526_s23 = int_to_ptr.vmem [resolvable:$false] %s1525_s23 }
  0x24   : > { %s1527_s28 = scalar_lea.vmem %s1526_s23, 1024  ;;  %p1528_p10 = scmp.lt.s32.totalorder %s164_s6, %s1526_s23 }
  0x25   : > { %p1524_p9 = pneg %p1523_p8  ;;  %p1529_p11 = scmp.lt.s32.totalorder %s1527_s28, %s1520_s17 }
  0x27   : > { %p1530_p13 = por %p1529_p11, %p1528_p10 }
  0x29   : > { %p1531_p0 = pnand %p1530_p13, %p1524_p9 }
  0x2b   : > { %1534 = shalt.err (!%p1531_p0)
}
  0x2c   : > { %s1658_s25 = smov 256   ;;  %s1659_s26 = smov 128  }
  0x2d   : > { %s1660_s29 = smov 8   ;;  %p1339_p3 = scmp.ge.s32.totalorder %s1655_s22, 1 }
  0x2e   : > { %1397 = dma.hbm_to_vmem [thread:$0]  (!%p1795_p4), %s162_s27, 512, %s164_s6, %s152_s9, %s1658_s25, %s1659_s26, %s1660_s29  }
  0x2f   : > { %p171_p1 = scmp.lt.s32.totalorder %s1655_s22, 5 }
  0x31   : > { %p172_p5 = pnand %p1339_p3, %p171_p1 }
  0x32   : > { %s177_s11 = sand.u32 (!%p172_p5), 1, %s1631_s16  }
  0x33   : > { %175 = sbr.rel (%p172_p5) target bundleno = 844 (0x34c), region = 32  ;;  %s1340_s5 = sshll.u32 (!%p172_p5), %s177_s11, 5 }
  0x34   : > { %s178_s17 = scalar_lea.sflag (!%p172_p5), [#allocation5], %s177_s11  ;;  %s181_s30 = scalar_lea.vmem (!%p172_p5), [#allocation4], %s1340_s5 }
  0x38   : > { %1606 = dma.done.wait (%p1762_p7), %s178_s17, 512  }
  0x39   : > { %1608 = vsyncadd (%p1762_p7), %s178_s17, 4294966784  ;;  %s201_s15 = sand.u32 1, %s1619_s13   ;;  %p1341_p4 = scmp.ne.s32.totalorder %s1639_s18, 0 }
  0x3a   : > { %s1813_s9 = scalar_lea.vmem [#allocation7], %s201_s15 }
  0x3b   : > { %206 = sbr.rel (%p1341_p4) target bundleno = 66 (0x42), region = 40 }
  0x40   : > { %vm207_vm0 = vcmask 253952   ;;  %v1661_v0 = vmov -inf   ;;  %v1662_v1 = vmov 0.0  }
  0x41   : > { %208 = vst.msk [vmem:[#allocation2] sm:$0x1] %vm207_vm0, %v1661_v0  ;;  %209 = vst.msk [vmem:[#allocation3] sm:$0x1] %vm207_vm0, %v1662_v1 }
  0x42 PF: > { %v210_v2 = vld [vmem:[%s181_s30] sm:$0xff]  ;;  %v211_v3 = vld [vmem:[%s181_s30 + $0x8] sm:$0xff]  ;;  %v212_v4 = vld [vmem:[%s181_s30 + $0x10] sm:$0xff]  ;;  %v1663_v6 = vmov 0   ;;  %v227_v7 = vlaneseq  ;;  %v1664_v8 = vmov 1966171168  }
  0x43   : > { %215 = vmax.xlane.f32.xlu0 %v210_v2  ;;  %609 = vadd.xlane.f32.xlu1 %v210_v2  ;;  %v213_v5 = vld [vmem:[%s181_s30 + $0x18] sm:$0xff]  ;;  %v360_v9 = vunpack.c.l.s4 %v1664_v8  ;;  %vm574_vm1 = vcmask 130112   ;;  %vm581_vm2 = vcmask 195712   ;;  %vm588_vm3 = vcmask 261312   ;;  %p1342_p7 = scmp.ne.s32.totalorder %s1639_s18, 1 }
  0x44   : > { %1501 = vset.pattern.permute.xlu0 %v1663_v6  ;;  %1502 = vset.pattern.permute.xlu1 %v1663_v6  ;;  %v1817_v10 = vshrl.u32 %v227_v7, 7  ;;  %vm606_vm4 = vcmask 253952  }
  0x45   : > { %v361_v11 = vunpack.c.0.s8 %v360_v9 }
  0x46   : > { %v1820_v12 = vsub.s32 0, %v1817_v10  ;;  %v1823_v13 = vsub.s32 1, %v1817_v10  ;;  %v1826_v14 = vsub.s32 2, %v1817_v10  ;;  %v1829_v15 = vsub.s32 3, %v1817_v10 }
  0x47   : > { %217 = vmax.xlane.f32.xlu0 %v211_v3  ;;  %611 = vadd.xlane.f32.xlu1 %v211_v3  ;;  %v1832_v16 = vsub.s32 4, %v1817_v10  ;;  %v1835_v17 = vsub.s32 5, %v1817_v10  ;;  %v1838_v18 = vsub.s32 6, %v1817_v10  ;;  %v1841_v19 = vsub.s32 7, %v1817_v10 }
  0x48   : > { %v1844_v22 = vsub.s32 %v361_v11, %v1817_v10 }
  0x4b   : > { %219 = vmax.xlane.f32.xlu0 %v212_v4  ;;  %613 = vadd.xlane.f32.xlu1 %v212_v4 }
  0x4f   : > { %221 = vmax.xlane.f32.xlu0 %v213_v5  ;;  %615 = vadd.xlane.f32.xlu1 %v213_v5 }
  0xcc   : > { %v216_v20 = vpop.xlane.xlu0 %215  ;;  %v610_v21 = vpop.xlane.xlu1 %609 }
  0xcd   : > { %v230_v23 = vrot.slane %v216_v20, %v1820_v12  ;;  %v234_v24 = vrot.slane %v216_v20, %v1823_v13  ;;  %v238_v25 = vrot.slane %v216_v20, %v1826_v14  ;;  %v242_v26 = vrot.slane %v216_v20, %v1829_v15 }
  0xce   : > { %v246_v27 = vrot.slane %v216_v20, %v1832_v16  ;;  %v250_v28 = vrot.slane %v216_v20, %v1835_v17  ;;  %v254_v29 = vrot.slane %v216_v20, %v1838_v18  ;;  %v258_v30 = vrot.slane %v216_v20, %v1841_v19 }
  0xcf   : > { %v355_v31 = vcombine.low %v230_v23, %v234_v24  ;;  %v356_v32 = vcombine.low %v238_v25, %v242_v26  ;;  %v624_v33 = vrot.slane %v610_v21, %v1820_v12  ;;  %v628_v34 = vrot.slane %v610_v21, %v1823_v13 }
  0xd0   : > { %v218_v35 = vpop.xlane.xlu0 %217  ;;  %v357_v36 = vcombine.low %v246_v27, %v250_v28  ;;  %v358_v37 = vcombine.low %v254_v29, %v258_v30  ;;  %v632_v38 = vrot.slane %v610_v21, %v1826_v14  ;;  %v636_v39 = vrot.slane %v610_v21, %v1829_v15  ;;  %v612_v60 = vpop.xlane.xlu1 %611 }
  0xd1   : > { %v365_v40 = vrot.slane %v355_v31, %v1844_v22  ;;  %v372_v41 = vrot.slane %v356_v32, %v1844_v22  ;;  %v262_v42 = vrot.slane %v218_v35, %v1820_v12  ;;  %v266_v43 = vrot.slane %v218_v35, %v1823_v13 }
  0xd2   : > { %v379_v44 = vrot.slane %v357_v36, %v1844_v22  ;;  %v386_v45 = vrot.slane %v358_v37, %v1844_v22  ;;  %v270_v46 = vrot.slane %v218_v35, %v1826_v14  ;;  %v274_v47 = vrot.slane %v218_v35, %v1829_v15 }
  0xd3   : > { %v387_v48 = vcombine.low %v365_v40, %v372_v41  ;;  %v278_v49 = vrot.slane %v218_v35, %v1832_v16  ;;  %v282_v50 = vrot.slane %v218_v35, %v1835_v17  ;;  %v286_v51 = vrot.slane %v218_v35, %v1838_v18 }
  0xd4   : > { %v388_v52 = vcombine.low %v379_v44, %v386_v45  ;;  %v290_v53 = vrot.slane %v218_v35, %v1841_v19  ;;  %v404_v54 = vcombine.low %v262_v42, %v266_v43  ;;  %v405_v55 = vcombine.low %v270_v46, %v274_v47  ;;  %v220_v32 = vpop.xlane.xlu0 %219 }
  0xd5   : > { %v395_v56 = vrot.slane %v387_v48, %v1844_v22  ;;  %v406_v57 = vcombine.low %v278_v49, %v282_v50  ;;  %v640_v58 = vrot.slane %v610_v21, %v1832_v16  ;;  %v644_v59 = vrot.slane %v610_v21, %v1835_v17  ;;  %v614_v49 = vpop.xlane.xlu1 %613 }
  0xd6   : > { %v402_v61 = vrot.slane %v388_v52, %v1844_v22  ;;  %v407_v62 = vcombine.low %v286_v51, %v290_v53  ;;  %v414_v63 = vrot.slane %v404_v54, %v1844_v22  ;;  %v421_v0 = vrot.slane %v405_v55, %v1844_v22 }
  0xd7   : > { %v428_v1 = vrot.slane %v406_v57, %v1844_v22  ;;  %v648_v2 = vrot.slane %v610_v21, %v1838_v18  ;;  %v652_v3 = vrot.slane %v610_v21, %v1841_v19  ;;  %v749_v4 = vcombine.low %v624_v33, %v628_v34 }
  0xd8   : > { %v403_v5 = vcombine.low %v395_v56, %v402_v61  ;;  %v435_v6 = vrot.slane %v407_v62, %v1844_v22  ;;  %v436_v8 = vcombine.low %v414_v63, %v421_v0  ;;  %v750_v9 = vcombine.low %v632_v38, %v636_v39 }
  0xd9   : > { %v751_v11 = vcombine.low %v640_v58, %v644_v59  ;;  %v752_v20 = vcombine.low %v648_v2, %v652_v3  ;;  %v759_v23 = vrot.slane %v749_v4, %v1844_v22  ;;  %v656_v24 = vrot.slane %v612_v60, %v1820_v12 }
  0xda   : > { %552 = vperm.xlu0 %1501, %v403_v5   ;;  %v437_v25 = vcombine.low %v428_v1, %v435_v6  ;;  %v444_v26 = vrot.slane %v436_v8, %v1844_v22  ;;  %v766_v27 = vrot.slane %v750_v9, %v1844_v22  ;;  %v660_v21 = vrot.slane %v612_v60, %v1823_v13 }
  0xdb   : > { %v773_v28 = vrot.slane %v751_v11, %v1844_v22  ;;  %v780_v29 = vrot.slane %v752_v20, %v1844_v22  ;;  %v664_v30 = vrot.slane %v612_v60, %v1826_v14  ;;  %v668_v31 = vrot.slane %v612_v60, %v1829_v15  ;;  %v222_v20 = vpop.xlane.xlu0 %221 }
  0xdc   : > { %v451_v33 = vrot.slane %v437_v25, %v1844_v22  ;;  %v781_v34 = vcombine.low %v759_v23, %v766_v27  ;;  %v672_v35 = vrot.slane %v612_v60, %v1832_v16  ;;  %v676_v36 = vrot.slane %v612_v60, %v1835_v17 }
  0xdd   : > { %v782_v37 = vcombine.low %v773_v28, %v780_v29  ;;  %v680_v38 = vrot.slane %v612_v60, %v1838_v18  ;;  %v684_v39 = vrot.slane %v612_v60, %v1841_v19  ;;  %v798_v40 = vcombine.low %v656_v24, %v660_v21 }
  0xde   : > { %v452_v41 = vcombine.low %v444_v26, %v451_v33  ;;  %v789_v42 = vrot.slane %v781_v34, %v1844_v22  ;;  %v799_v43 = vcombine.low %v664_v30, %v668_v31  ;;  %v800_v44 = vcombine.low %v672_v35, %v676_v36 }
  0xdf   : > { %v796_v45 = vrot.slane %v782_v37, %v1844_v22  ;;  %v801_v46 = vcombine.low %v680_v38, %v684_v39  ;;  %v808_v47 = vrot.slane %v798_v40, %v1844_v22  ;;  %v294_v48 = vrot.slane %v220_v32, %v1820_v12 }
  0xe0   : > { %555 = vperm.xlu1 %1502, %v452_v41   ;;  %v815_v50 = vrot.slane %v799_v43, %v1844_v22  ;;  %v822_v51 = vrot.slane %v800_v44, %v1844_v22  ;;  %v298_v52 = vrot.slane %v220_v32, %v1823_v13  ;;  %v302_v53 = vrot.slane %v220_v32, %v1826_v14 }
  0xe1   : > { %v797_v54 = vcombine.low %v789_v42, %v796_v45  ;;  %v829_v55 = vrot.slane %v801_v46, %v1844_v22  ;;  %v306_v56 = vrot.slane %v220_v32, %v1829_v15  ;;  %v310_v57 = vrot.slane %v220_v32, %v1832_v16  ;;  %v616_v42 = vpop.xlane.xlu1 %615 }
  0xe2   : > { %v830_v58 = vcombine.low %v808_v47, %v815_v50  ;;  %v314_v59 = vrot.slane %v220_v32, %v1835_v17  ;;  %v318_v60 = vrot.slane %v220_v32, %v1838_v18  ;;  %v322_v61 = vrot.slane %v220_v32, %v1841_v19 }
  0xe3   : > { %v831_v62 = vcombine.low %v822_v51, %v829_v55  ;;  %v453_v63 = vcombine.low %v294_v48, %v298_v52  ;;  %v454_v0 = vcombine.low %v302_v53, %v306_v56  ;;  %v688_v1 = vrot.slane %v614_v49, %v1820_v12 }
  0xe4   : > { %946 = vperm.xlu1 %1502, %v797_v54   ;;  %v838_v2 = vrot.slane %v830_v58, %v1844_v22  ;;  %v455_v3 = vcombine.low %v310_v57, %v314_v59  ;;  %v456_v4 = vcombine.low %v318_v60, %v322_v61  ;;  %v692_v5 = vrot.slane %v614_v49, %v1823_v13 }
  0xe5   : > { %v845_v6 = vrot.slane %v831_v62, %v1844_v22  ;;  %v463_v8 = vrot.slane %v453_v63, %v1844_v22  ;;  %v470_v9 = vrot.slane %v454_v0, %v1844_v22  ;;  %v696_v11 = vrot.slane %v614_v49, %v1826_v14 }
  0xe6   : > { %v477_v23 = vrot.slane %v455_v3, %v1844_v22  ;;  %v484_v24 = vrot.slane %v456_v4, %v1844_v22  ;;  %v700_v25 = vrot.slane %v614_v49, %v1829_v15  ;;  %v704_v26 = vrot.slane %v614_v49, %v1832_v16 }
  0xe7   : > { %v846_v27 = vcombine.low %v838_v2, %v845_v6  ;;  %v485_v21 = vcombine.low %v463_v8, %v470_v9  ;;  %v708_v28 = vrot.slane %v614_v49, %v1835_v17  ;;  %v712_v29 = vrot.slane %v614_v49, %v1838_v18 }
  0xe8   : > { %v486_v30 = vcombine.low %v477_v23, %v484_v24  ;;  %v716_v31 = vrot.slane %v614_v49, %v1841_v19  ;;  %v847_v32 = vcombine.low %v688_v1, %v692_v5  ;;  %v848_v33 = vcombine.low %v696_v11, %v700_v25 }
  0xe9   : > { %949 = vperm.xlu1 %1502, %v846_v27   ;;  %v493_v34 = vrot.slane %v485_v21, %v1844_v22  ;;  %v849_v35 = vcombine.low %v704_v26, %v708_v28  ;;  %v326_v36 = vrot.slane %v222_v20, %v1820_v12  ;;  %v330_v37 = vrot.slane %v222_v20, %v1823_v13 }
  0xea   : > { %v500_v38 = vrot.slane %v486_v30, %v1844_v22  ;;  %v850_v39 = vcombine.low %v712_v29, %v716_v31  ;;  %v857_v40 = vrot.slane %v847_v32, %v1844_v22  ;;  %v864_v41 = vrot.slane %v848_v33, %v1844_v22 }
  0xeb   : > { %v871_v43 = vrot.slane %v849_v35, %v1844_v22  ;;  %v334_v44 = vrot.slane %v222_v20, %v1826_v14  ;;  %v338_v45 = vrot.slane %v222_v20, %v1829_v15  ;;  %v342_v46 = vrot.slane %v222_v20, %v1832_v16 }
  0xec   : > { %v501_v47 = vcombine.low %v493_v34, %v500_v38  ;;  %v878_v48 = vrot.slane %v850_v39, %v1844_v22  ;;  %v879_v49 = vcombine.low %v857_v40, %v864_v41  ;;  %v346_v50 = vrot.slane %v222_v20, %v1835_v17 }
  0xed   : > { %v350_v51 = vrot.slane %v222_v20, %v1838_v18  ;;  %v354_v52 = vrot.slane %v222_v20, %v1841_v19  ;;  %v502_v53 = vcombine.low %v326_v36, %v330_v37  ;;  %v503_v54 = vcombine.low %v334_v44, %v338_v45 }
  0xee   : > { %558 = vperm.xlu1 %1502, %v501_v47   ;;  %v880_v55 = vcombine.low %v871_v43, %v878_v48  ;;  %v887_v56 = vrot.slane %v879_v49, %v1844_v22  ;;  %v504_v57 = vcombine.low %v342_v46, %v346_v50  ;;  %v720_v58 = vrot.slane %v616_v42, %v1820_v12 }
  0xef   : > { %v505_v59 = vcombine.low %v350_v51, %v354_v52  ;;  %v512_v60 = vrot.slane %v502_v53, %v1844_v22  ;;  %v519_v61 = vrot.slane %v503_v54, %v1844_v22  ;;  %v724_v62 = vrot.slane %v616_v42, %v1823_v13 }
  0xf0   : > { %v894_v63 = vrot.slane %v880_v55, %v1844_v22  ;;  %v526_v0 = vrot.slane %v504_v57, %v1844_v22  ;;  %v728_v1 = vrot.slane %v616_v42, %v1826_v14  ;;  %v732_v2 = vrot.slane %v616_v42, %v1829_v15  ;;  %v214_v55 = vld [vmem:[#allocation2] sm:$0x1] }
  0xf1   : > { %v533_v3 = vrot.slane %v505_v59, %v1844_v22  ;;  %v534_v4 = vcombine.low %v512_v60, %v519_v61  ;;  %v736_v12 = vrot.slane %v616_v42, %v1832_v16  ;;  %v740_v5 = vrot.slane %v616_v42, %v1835_v17 }
  0xf2   : > { %v895_v6 = vcombine.low %v887_v56, %v894_v63  ;;  %v744_v8 = vrot.slane %v616_v42, %v1838_v18  ;;  %v748_v13 = vrot.slane %v616_v42, %v1841_v19  ;;  %v896_v9 = vcombine.low %v720_v58, %v724_v62  ;;  %v608_v63 = vld [vmem:[#allocation3] sm:$0x1] }
  0xf3   : > { %v535_v11 = vcombine.low %v526_v0, %v533_v3  ;;  %v542_v20 = vrot.slane %v534_v4, %v1844_v22  ;;  %v897_v23 = vcombine.low %v728_v1, %v732_v2  ;;  %v898_v14 = vcombine.low %v736_v12, %v740_v5 }
  0xf4   : > { %952 = vperm.xlu1 %1502, %v895_v6   ;;  %v899_v15 = vcombine.low %v744_v8, %v748_v13  ;;  %v906_v24 = vrot.slane %v896_v9, %v1844_v22  ;;  %v564_v33 = vand.u32 127, %v227_v7 }
  0xf5   : > { %v549_v25 = vrot.slane %v535_v11, %v1844_v22  ;;  %v913_v16 = vrot.slane %v897_v23, %v1844_v22  ;;  %v920_v17 = vrot.slane %v898_v14, %v1844_v22 }
  0xf6   : > { %v927_v18 = vrot.slane %v899_v15, %v1844_v22  ;;  %v569_v34 = vadd.s32 4294967288, %v564_v33  ;;  %v576_v36 = vadd.s32 4294967280, %v564_v33  ;;  %v583_v38 = vadd.s32 4294967272, %v564_v33 }
  0xf7   : > { %v550_v26 = vcombine.low %v542_v20, %v549_v25  ;;  %v928_v19 = vcombine.low %v906_v24, %v913_v16  ;;  %v567_v40 = vsub.s32 %v564_v33, %v1817_v10 }
  0xf8   : > { %v929_v27 = vcombine.low %v920_v17, %v927_v18  ;;  %v572_v37 = vsub.s32 %v569_v34, %v1817_v10  ;;  %v579_v39 = vsub.s32 %v576_v36, %v1817_v10  ;;  %v586_v44 = vsub.s32 %v583_v38, %v1817_v10 }
  0xf9   : > { %561 = vperm.xlu1 %1502, %v550_v26   ;;  %v936_v21 = vrot.slane %v928_v19, %v1844_v22 }
  0xfa   : > { %v943_v28 = vrot.slane %v929_v27, %v1844_v22 }
  0xfc   : > { %v944_v29 = vcombine.low %v936_v21, %v943_v28 }
  0xfe   : > { %955 = vperm.xlu1 %1502, %v944_v29  }
 0x155   : > { %v553_v42 = vpop.permute.xlu0 %552 }
 0x156   : > { %v568_v46 = vrot.slane %v553_v42, %v567_v40 }
 0x15b   : > { %v556_v30 = vpop.permute.xlu1 %555 }
 0x15c   : > { %v573_v43 = vrot.slane %v556_v30, %v572_v37 }
 0x15e   : > { %v575_v47 = vsel %vm574_vm1, %v573_v43, %v568_v46 }
 0x15f   : > { %v947_v31 = vpop.permute.xlu1 %946 }
 0x160   : > { %v960_v53 = vrot.slane %v947_v31, %v567_v40 }
 0x164   : > { %v950_v32 = vpop.permute.xlu1 %949 }
 0x165   : > { %v964_v49 = vrot.slane %v950_v32, %v572_v37 }
 0x167   : > { %v965_v56 = vsel %vm574_vm1, %v964_v49, %v960_v53 }
 0x169   : > { %v559_v35 = vpop.permute.xlu1 %558 }
 0x16a   : > { %v580_v45 = vrot.slane %v559_v35, %v579_v39 }
 0x16c   : > { %v582_v50 = vsel %vm581_vm2, %v580_v45, %v575_v47 }
 0x16f   : > { %v953_v41 = vpop.permute.xlu1 %952 }
 0x170   : > { %v969_v51 = vrot.slane %v953_v41, %v579_v39 }
 0x172   : > { %v970_v59 = vsel %vm581_vm2, %v969_v51, %v965_v56 }
 0x174   : > { %v562_v7 = vpop.permute.xlu1 %561 }
 0x175   : > { %v587_v48 = vrot.slane %v562_v7, %v586_v44 }
 0x177   : > { %v589_v52 = vsel %vm588_vm3, %v587_v48, %v582_v50 }
 0x178   : > { %v596_v54 = vrot.slane %v589_v52, %v1844_v22 }
 0x179   : > { %v956_v10 = vpop.permute.xlu1 %955 }
 0x17a   : > { %v603_v57 = vrot.slane %v596_v54, %v1844_v22  ;;  %v974_v58 = vrot.slane %v956_v10, %v586_v44 }
 0x17c   : > { %v605_v60 = vmax.f32 %v214_v55, %v603_v57  ;;  %v975_v61 = vsel %vm588_vm3, %v974_v58, %v970_v59 }
 0x17d   : > { %v982_v62 = vrot.slane %v975_v61, %v1844_v22 }
 0x17e   : > { %607 = vst.msk [vmem:[#allocation2] sm:$0x1] %vm606_vm4, %v605_v60 }
 0x17f   : > { %v989_v0 = vrot.slane %v982_v62, %v1844_v22  ;;  %996 = sbr.rel (%p1342_p7) target bundleno = 821 (0x335), region = 44 }
 0x181   : > { %v991_v1 = vadd.f32 %v989_v0, %v608_v63 }
 0x183   : > { %992 = vst.msk [vmem:[#allocation3] sm:$0x1] %vm606_vm4, %v991_v1 }
 0x184   : > { %v1003_v2 = vld [vmem:[%s2050_s1 + $0x18] sm:$0xff]  ;;  %v1665_v3 = vmov 0.0   ;;  %v1002_v4 = vld [vmem:[%s2050_s1 + $0x10] sm:$0xff]  ;;  %v1001_v22 = vld [vmem:[%s2050_s1 + $0x8] sm:$0xff]  ;;  %vm1005_vm5 = vcmask 261120   ;;  %vm1666_vm6 = vmmov 0  }
 0x185   : > { %1363 = vmatprep.subr.mxu0 %v1665_v3  ;;  %1374 = vmatprep.subr.mxu1 %v1665_v3  ;;  %v1000_v5 = vld [vmem:[%s2050_s1] sm:$0xff]  ;;  %vm1159_vm7 = vcmask 1041408   ;;  %vm1155_vm8 = vcmask 15360  }
 0x186   : > { %1364 = vmatpush3.msra.mxu0 %v1003_v2  ;;  %1375 = vmatpush3.msra.mxu1 %v1003_v2  ;;  %v997_v8 = vld [vmem:[#allocation2] sm:$0x1] }
 0x187   : > { %1365 = vmatprep.subr.mxu0 %v1665_v3  ;;  %1376 = vmatprep.subr.mxu1 %v1665_v3  ;;  %v1004_v13 = vld [vmem:[%s2051_s2] sm:$0x3] }
 0x188   : > { %1366 = vmatpush3.msra.mxu0 %v1002_v4  ;;  %1377 = vmatpush3.msra.mxu1 %v1002_v4 }
 0x189   : > { %1367 = vmatprep.subr.mxu0 %v1665_v3  ;;  %1378 = vmatprep.subr.mxu1 %v1665_v3 }
 0x18a   : > { %v998_v12 = vld [vmem:[#allocation3] sm:$0x1]  ;;  %1368 = vmatpush3.msra.mxu0 %v1001_v22  ;;  %1379 = vmatpush3.msra.mxu1 %v1001_v22 }
 0x18b   : > { %v999_v6 = vmul.f32 0.00390625, %v998_v12  ;;  %1369 = vmatprep.subr.mxu0 %v1665_v3  ;;  %1380 = vmatprep.subr.mxu1 %v1665_v3 }
 0x18c   : > { %1370 = vmatpush3.msra.mxu0 %v1000_v5  ;;  %1371 = vmatprep.mubr.msk.f32.mxu0 %vm1666_vm6, %v1665_v3 }
 0x18d   : > { %1381 = vmatpush3.msra.mxu1 %v1000_v5  ;;  %1382 = vmatprep.mubr.msk.f32.mxu1 %vm1666_vm6, %v1665_v3 }
 0x18e   : > { %1372 = vmatmul.mubr.msk.f32.vlgmr.msra.gmra.mxu0 %vm1005_vm5, %v997_v8  ;;  %1383 = vmatmul.mubr.msk.f32.vlgmr.msra.gmra.mxu1 %vm1005_vm5, %v999_v6 }
 0x18f   : > { %1385 = vmatprep.subr.mxu0 %v1665_v3  ;;  %1387 = vmatprep.mubr.msk.f32.mxu0 %vm1666_vm6, %v1665_v3 }
 0x190   : > { %1386 = vmatpush3.msk.msra.mxu0 %vm1159_vm7, %v1004_v13 }
 0x24e   : > { %v1075_v9 = vpop.f32.mrf.mxu0  ;;  %v1149_v11 = vpop.f32.mrf.mxu1 }
 0x24f   : > { %v1079_v20 = vmax.f32 %v1075_v9, 0.0  ;;  %v1153_v23 = vmax.f32 %v1149_v11, 0.0 }
 0x250   : > { %v1373_v14 = vpop.f32.mrf.mxu0  ;;  %v1384_v15 = vpop.f32.mrf.mxu1 }
 0x251   : > { %v1154_v24 = vadd.f32 %v1153_v23, %v1079_v20 }
 0x253   : > { %1388 = vmatmul.mubr.msk.f32.vlgmr.msra.gmra.mxu0 %vm1155_vm8, %v1154_v24 }
 0x313   : > { %v1229_v25 = vpop.f32.mrf.mxu0 }
 0x314   : > { %v1347_v16 = vmul.f32 -1.442695, %v1229_v25 }
 0x315   : > { %v1389_v17 = vpop.f32.mrf.mxu0 }
 0x316   : > { %1503 = vpow2.f32 %v1347_v16 }
 0x323   : > { %v1504_v18 = vpop.eup %1503 }
 0x324   : > { %v1236_v26 = vadd.f32 1.0, %v1504_v18 }
 0x326   : > { %1505 = vrcp.f32 %v1236_v26 }
 0x333   : > { %v1506_v19 = vpop.eup %1505 }
 0x334   : > { %1239 = vst.msk [vmem:[%s1813_s9] sm:$0x1] %vm606_vm4, %v1506_v19 }
 0x335 PF: > { %s1348_s11 = sshll.u32 %s1643_s19, 4  ;;  %s1253_s4 = sshll.u32 %s1813_s9, 4  ;;  %s1254_s4 = int_to_ptr.vmem [resolvable:$true] %s1253_s4 }
 0x336   : > { %s1251_s30 = scalar_lea.hbm %s2052_s3, %s1348_s11  ;;  %s1241_s6 = scalar_lea.sflag [#allocation6], %s201_s15 }
 0x337   : > { %s1535_s27 = scalar_lea.vmem %s1254_s4, 16  ;;  %s1667_s24 = smov [#allocation7]  }
 0x338   : > { %p1536_p6 = scmp.ne.s32.totalorder %s1254_s4, %s1535_s27  ;;  %s1539_s23 = sshll.u32 %s1667_s24, 4  ;;  %s1540_s23 = int_to_ptr.vmem [resolvable:$false] %s1539_s23 }
 0x339   : > { %s1541_s28 = scalar_lea.vmem %s1540_s23, 32  ;;  %p1542_p10 = scmp.lt.s32.totalorder %s1254_s4, %s1540_s23 }
 0x33a   : > { %p1537_p8 = pnand %p1536_p6, %p1770_p12  ;;  %p1543_p11 = scmp.lt.s32.totalorder %s1541_s28, %s1535_s27 }
 0x33c   : > { %p1538_p9 = pneg %p1537_p8  ;;  %p1544_p13 = por %p1543_p11, %p1542_p10 }
 0x33e   : > { %p1545_p0 = pnand %p1544_p13, %p1538_p9 }
 0x340   : > { %1548 = shalt.err (!%p1545_p0)
}
 0x341   : > { %s1549_s19 = scalar_lea.hbm %s1251_s30, 16  ;;  %s1553_s18 = scalar_lea.hbm %s2052_s3, 32 }
 0x342   : > { %p1550_p3 = scmp.ne.s32.totalorder %s1251_s30, %s1549_s19  ;;  %p1554_p4 = scmp.lt.s32.totalorder %s1251_s30, %s2052_s3 }
 0x343   : > { %p1555_p7 = scmp.lt.s32.totalorder %s1553_s18, %s1549_s19 }
 0x344   : > { %p1551_p1 = pnand %p1550_p3, %p1770_p12 }
 0x345   : > { %p1556_p6 = por %p1555_p7, %p1554_p4 }
 0x346   : > { %p1552_p5 = pneg %p1551_p1 }
 0x348   : > { %p1557_p8 = pnand %p1556_p6, %p1552_p5 }
 0x34a   : > { %1560 = shalt.err (!%p1557_p8)
}
 0x34b   : > { %1392 = dma.vmem_to_hbm [thread:$0]  (%p1770_p12), %s1254_s4, 16, %s1251_s30, %s1241_s6  }
 0x34c PF: > { %p1403_p9 = scmp.ge.s32.totalorder %s1655_s22, 2  ;;  %s1265_s29 = sand.u32 1, %s1615_s12  }
 0x34d   : > { %s1266_s11 = scalar_lea.sflag [#allocation6], %s1265_s29 }
 0x34e   : > { %p1399_p10 = pnand %p1403_p9, %p1783_p2 }
 0x350   : > { %p1400_p11 = pneg %p1399_p10 }
 0x352   : > { %1610 = dma.done.wait (%p1400_p11), %s1266_s11, 16  }
 0x353   : > { %1612 = vsyncadd (%p1400_p11), %s1266_s11, 4294967280  ;;  %s19_s22 = sadd.s32 1, %s1655_s22   ;;  %s2065_s7 = sld [smem:[#allocation10_spill]] }
 0x354   : > { %p16_p13 = scmp.ge.s32.totalorder %s19_s22, 6   ;;  %s2066_s17 = sld [smem:[#allocation13_spill]] }
 0x355   : > { %s2067_s5 = sld [smem:[#allocation11_spill]]  ;;  %s2069_s12 = smov %s1619_s13 }
 0x356   : > { %s2068_s30 = sld [smem:[#allocation12_spill]]  ;;  %s2070_s13 = smov %s1623_s14 }
 0x357   : > { %s2071_s14 = smov %s1775_s8  ;;  %s2072_s15 = smov %s1631_s16 }
 0x358   : > { %s2074_s18 = smov %s1647_s20  ;;  %s2075_s19 = smov %s1651_s21 }
 0x359   : > { %s2073_s16 = smov %s2065_s7  ;;  %18 = sbr.rel (!%p16_p13) target bundleno = 9 (0x9), region = 85 }
 0x35b   : > { %s2076_s20 = smov %s2067_s5 }
 0x35c   : > { %s2077_s21 = smov %s2068_s30 }
 0x35e   :  { %1270 = vsyncpa [#allocation5], 1 }
 0x35f   :  { %1272 = vsyncpa [#allocation5 + $0x1], 1 }
 0x360   :  { %1273 = vsyncpa [#allocation6], 1 }
 0x361   :  { %1275 = vsyncpa [#allocation6 + $0x1], 1 }

</bundles_post_ra>
